<compile_context>
chip_gen: v7x
topology: tpu7x:2x2x1
jax: 0.10.0
libtpu: 0.0.40
codegen_flags: <defaults>
</compile_context>

<pallas_src>
import jax
import jax.numpy as jnp
from jax import lax
from jax.experimental import pallas as pl
from jax.experimental.pallas import tpu as pltpu


def _vmem_spec():
    return pl.BlockSpec(memory_space=pltpu.MemorySpace.VMEM)


# ---------------------------------------------------------------------------
# Fused VAT power-iteration kernel (clean pass + vat_iter adversarial passes +
# per-row L2 normalizations + final LDS), everything resident in VMEM.
# ---------------------------------------------------------------------------
def vat_power_iteration(xf, r0f, w, b, *, xi, eps, vat_iter):
    """xf, r0f: [B, D] f32; w: [C, D]; b: [1, C] -> (r_adv [B, D], lds [1, 1])."""
    B, D = xf.shape
    xi = float(xi)            # Python scalars -> jaxpr literals (NOT captured constants)
    eps = float(eps)
    inv_b = 1.0 / float(B)

    def log_softmax(z):
        m = jnp.max(z, axis=-1, keepdims=True)
        s = z - m
        return s - jnp.log(jnp.sum(jnp.exp(s), axis=-1, keepdims=True))

    def l2n(r):
        # [B,1] reciprocal + broadcast vmul; no [B,D] divide.
        nrm = jnp.sqrt(jnp.sum(r * r, axis=-1, keepdims=True))
        return r * (1.0 / (nrm + 1e-9))

    def kernel(xf_ref, r0_ref, w_ref, b_ref, out_ref, lds_ref):
        x = xf_ref[...]
        w_v = w_ref[...]          # single [C, D] weight tile, used by BOTH matmuls
        bias = b_ref[...]

        def logits_of(v):         # v @ W^T  (contract D with D; no transposed copy of W)
            return lax.dot_general(
                v, w_v,
                dimension_numbers=(((1,), (1,)), ((), ())),
                preferred_element_type=jnp.float32)

        # Clean/target pass: log_softmax(model(x)).
        z0 = logits_of(x) + bias
        logp_t = log_softmax(z0)
        p_t = jnp.exp(logp_t)

        # r = l2_normalize(r0)
        rf0 = l2n(r0_ref[...])

        def body(_, rf):
            # (x + xi*r) @ W^T + b  ==  z0 + xi * (r @ W^T)   (linear model; exact)
            z_adv = z0 + xi * logits_of(rf)
            logp_adv = log_softmax(z_adv)
            # analytic grad of KLDiv(log_target=True, 'batchmean') w.r.t. r_flat, up to the
            # positive constant xi/B, which the following normalization erases.
            dz = jnp.exp(logp_adv) - p_t
            g = jnp.dot(dz, w_v, preferred_element_type=jnp.float32)
            return l2n(g)

        rf = lax.fori_loop(0, vat_iter, body, rf0, unroll=True)

        out_ref[...] = rf * eps                      # lane-dense [B, D] f32 store

        # Fused LDS: KL(p_t || softmax(model(x + eps*r))), reduction='batchmean'.
        z_f = z0 + eps * logits_of(rf)
        logp_f = log_softmax(z_f)
        kl_rows = jnp.sum(p_t * (logp_t - logp_f), axis=-1, keepdims=True)   # [B, 1]
        lds_ref[...] = jnp.sum(kl_rows, axis=0, keepdims=True) * inv_b       # [1, 1]

    return pl.pallas_call(
        kernel,
        out_shape=(jax.ShapeDtypeStruct((B, D), jnp.float32),
                   jax.ShapeDtypeStruct((1, 1), jnp.float32)),
        in_specs=[_vmem_spec(), _vmem_spec(), _vmem_spec(), _vmem_spec()],
        out_specs=(_vmem_spec(), _vmem_spec()),
    )(xf, r0f, w, b)


# ---------------------------------------------------------------------------
# VATLoss forward (thin glue; all hot-path work is inside the single kernel).
# Returns (r_adv, lds): r_adv is the module's return value; lds is the fused KL.
# ---------------------------------------------------------------------------
def vat_loss_forward(x, r0, w, b, *, xi, eps, vat_iter):
    B = x.shape[0]
    xf = x.reshape(B, -1)          # row-major flatten == torch .view
    rf = r0.reshape(B, -1)
    r_adv_flat, lds = vat_power_iteration(xf, rf, w, b,
                                          xi=xi, eps=eps, vat_iter=vat_iter)
    return r_adv_flat.reshape(x.shape), lds[0, 0]


# ---------------------------------------------------------------------------
# Pure-JAX reference (autograd through the same linear model) for validation.
# ---------------------------------------------------------------------------
def vat_loss_reference(x, r0, w, b, *, xi, eps, vat_iter):
    B = x.shape[0]
    xf = x.reshape(B, -1)

    def model(xin):
        return xin @ w.T + b

    def l2n(rf):
        nrm = jnp.sqrt(jnp.sum(rf * rf, axis=1, keepdims=True))
        return rf / (nrm + 1e-9)

    logp_t = jax.nn.log_softmax(model(xf), axis=-1)
    p_t = jnp.exp(logp_t)
    rf = l2n(r0.reshape(B, -1))

    def loss_fn(rr):
        logp_adv = jax.nn.log_softmax(model(xf + xi * rr), axis=-1)
        # KLDivLoss(log_target=True, reduction='batchmean')
        return jnp.sum(p_t * (logp_t - logp_adv)) / B

    for _ in range(vat_iter):
        rf = l2n(jax.grad(loss_fn)(rf))

    r_adv = rf * eps
    logp_f = jax.nn.log_softmax(model(xf + r_adv), axis=-1)
    lds = jnp.sum(p_t * (logp_t - logp_f)) / B
    return r_adv.reshape(x.shape), lds


if __name__ == "__main__":
    # VAT hyperparameters (args.vat_xi, args.vat_eps, args.vat_iter).
    # xi=10.0 is the common VAT-pytorch default and keeps the finite-difference softmax
    # delta far above f32 ulp, so the kernel-vs-autograd comparison is well-conditioned.
    XI, EPS, VAT_ITER = 10.0, 2.0, 2
    B, C, H, W = 2, 4, 16, 16
    NUM_CLASSES = 10
    D = C * H * W

    key = jax.random.PRNGKey(0)
    kx, kr, kw, kb = jax.random.split(key, 4)

    x = jax.random.normal(kx, (B, C, H, W), dtype=jnp.float32)
    r0 = jax.random.normal(kr, (B, C, H, W), dtype=jnp.float32)   # torch.normal(0,1,x.shape)
    w = 0.02 * jax.random.normal(kw, (NUM_CLASSES, D), dtype=jnp.float32)
    bias = 0.01 * jax.random.normal(kb, (1, NUM_CLASSES), dtype=jnp.float32)

    r_adv, lds = vat_loss_forward(x, r0, w, bias, xi=XI, eps=EPS, vat_iter=VAT_ITER)
    r_adv = jax.block_until_ready(r_adv)
    lds = jax.block_until_ready(lds)

    r_ref, lds_ref = vat_loss_reference(x, r0, w, bias, xi=XI, eps=EPS, vat_iter=VAT_ITER)
    assert r_adv.shape == x.shape and r_adv.dtype == jnp.float32
    assert jnp.allclose(r_adv, r_ref, rtol=1e-3, atol=1e-4), "r_adv mismatch vs reference"
    assert jnp.allclose(lds, lds_ref, rtol=1e-3, atol=1e-5), "lds mismatch vs reference"

    print("KERNEL_OK")
</pallas_src>

<mosaic_0001>
module attributes {stable_mosaic.version = 11 : i64} {
  func.func @kernel(%arg0: memref<2x1024xf32, #tpu.memory_space<vmem>>, %arg1: memref<2x1024xf32, #tpu.memory_space<vmem>>, %arg2: memref<10x1024xf32, #tpu.memory_space<vmem>>, %arg3: memref<1x10xf32, #tpu.memory_space<vmem>>, %arg4: memref<2x1024xf32, #tpu.memory_space<vmem>>, %arg5: memref<1x1xf32, #tpu.memory_space<vmem>>) attributes {dimension_semantics = [], scalar_prefetch = 0 : i64, scratch_operands = 0 : i64, tpu.core_type = #tpu.core_type<tc>} {
    %c0 = arith.constant 0 : index
    %c0_0 = arith.constant 0 : index
    %0 = vector.load %arg0[%c0, %c0_0] : memref<2x1024xf32, #tpu.memory_space<vmem>>, vector<2x1024xf32>
    %c0_1 = arith.constant 0 : index
    %c0_2 = arith.constant 0 : index
    %1 = vector.load %arg2[%c0_1, %c0_2] : memref<10x1024xf32, #tpu.memory_space<vmem>>, vector<10x1024xf32>
    %c0_3 = arith.constant 0 : index
    %c0_4 = arith.constant 0 : index
    %2 = vector.load %arg3[%c0_3, %c0_4] : memref<1x10xf32, #tpu.memory_space<vmem>>, vector<1x10xf32>
    %cst = arith.constant dense<0.000000e+00> : vector<2x10xf32>
    %3 = tpu.matmul %0, %1, %cst {dimension_numbers = #tpu.dot_dimension_numbers<[1], [1], [0], [0], [0, 0, 1, 0], [], []>} : vector<2x1024xf32>, vector<10x1024xf32>, vector<2x10xf32> -> vector<2x10xf32>
    %4 = vector.broadcast %2 : vector<1x10xf32> to vector<2x10xf32>
    %5 = arith.addf %3, %4 : vector<2x10xf32>
    %cst_5 = arith.constant dense<0xFF800000> : vector<2xf32>
    %6 = vector.multi_reduction <maximumf>, %5, %cst_5 [1] : vector<2x10xf32> to vector<2xf32>
    %7 = vector.shape_cast %6 : vector<2xf32> to vector<2x1xf32>
    %8 = vector.broadcast %7 : vector<2x1xf32> to vector<2x10xf32>
    %9 = arith.subf %5, %8 : vector<2x10xf32>
    %10 = math.exp %9 : vector<2x10xf32>
    %cst_6 = arith.constant dense<0.000000e+00> : vector<2xf32>
    %11 = vector.multi_reduction <add>, %10, %cst_6 [1] : vector<2x10xf32> to vector<2xf32>
    %12 = vector.shape_cast %11 : vector<2xf32> to vector<2x1xf32>
    %13 = math.log %12 : vector<2x1xf32>
    %14 = vector.broadcast %13 : vector<2x1xf32> to vector<2x10xf32>
    %15 = arith.subf %9, %14 : vector<2x10xf32>
    %16 = math.exp %15 : vector<2x10xf32>
    %c0_7 = arith.constant 0 : index
    %c0_8 = arith.constant 0 : index
    %17 = vector.load %arg1[%c0_7, %c0_8] : memref<2x1024xf32, #tpu.memory_space<vmem>>, vector<2x1024xf32>
    %18 = arith.mulf %17, %17 : vector<2x1024xf32>
    %cst_9 = arith.constant dense<0.000000e+00> : vector<2xf32>
    %19 = vector.multi_reduction <add>, %18, %cst_9 [1] : vector<2x1024xf32> to vector<2xf32>
    %20 = vector.shape_cast %19 : vector<2xf32> to vector<2x1xf32>
    %21 = math.sqrt %20 : vector<2x1xf32>
    %cst_10 = arith.constant 9.99999971E-10 : f32
    %22 = vector.broadcast %cst_10 : f32 to vector<2x1xf32>
    %23 = arith.addf %21, %22 : vector<2x1xf32>
    %cst_11 = arith.constant 1.000000e+00 : f32
    %24 = vector.broadcast %cst_11 : f32 to vector<2x1xf32>
    %25 = arith.divf %24, %23 : vector<2x1xf32>
    %26 = vector.broadcast %25 : vector<2x1xf32> to vector<2x1024xf32>
    %27 = arith.mulf %17, %26 : vector<2x1024xf32>
    %c0_i32 = arith.constant 0 : i32
    %cst_12 = arith.constant dense<0.000000e+00> : vector<2x10xf32>
    %28 = tpu.matmul %27, %1, %cst_12 {dimension_numbers = #tpu.dot_dimension_numbers<[1], [1], [0], [0], [0, 0, 1, 0], [], []>} : vector<2x1024xf32>, vector<10x1024xf32>, vector<2x10xf32> -> vector<2x10xf32>
    %cst_13 = arith.constant 1.000000e+01 : f32
    %29 = vector.broadcast %cst_13 : f32 to vector<2x10xf32>
    %30 = arith.mulf %29, %28 : vector<2x10xf32>
    %31 = arith.addf %5, %30 : vector<2x10xf32>
    %cst_14 = arith.constant dense<0xFF800000> : vector<2xf32>
    %32 = vector.multi_reduction <maximumf>, %31, %cst_14 [1] : vector<2x10xf32> to vector<2xf32>
    %33 = vector.shape_cast %32 : vector<2xf32> to vector<2x1xf32>
    %34 = vector.broadcast %33 : vector<2x1xf32> to vector<2x10xf32>
    %35 = arith.subf %31, %34 : vector<2x10xf32>
    %36 = math.exp %35 : vector<2x10xf32>
    %cst_15 = arith.constant dense<0.000000e+00> : vector<2xf32>
    %37 = vector.multi_reduction <add>, %36, %cst_15 [1] : vector<2x10xf32> to vector<2xf32>
    %38 = vector.shape_cast %37 : vector<2xf32> to vector<2x1xf32>
    %39 = math.log %38 : vector<2x1xf32>
    %40 = vector.broadcast %39 : vector<2x1xf32> to vector<2x10xf32>
    %41 = arith.subf %35, %40 : vector<2x10xf32>
    %42 = math.exp %41 : vector<2x10xf32>
    %43 = arith.subf %42, %16 : vector<2x10xf32>
    %cst_16 = arith.constant dense<0.000000e+00> : vector<2x1024xf32>
    %44 = tpu.matmul %43, %1, %cst_16 {dimension_numbers = #tpu.dot_dimension_numbers<[1], [0], [0], [1], [0, 0, 1, 1], [], []>} : vector<2x10xf32>, vector<10x1024xf32>, vector<2x1024xf32> -> vector<2x1024xf32>
    %45 = arith.mulf %44, %44 : vector<2x1024xf32>
    %cst_17 = arith.constant dense<0.000000e+00> : vector<2xf32>
    %46 = vector.multi_reduction <add>, %45, %cst_17 [1] : vector<2x1024xf32> to vector<2xf32>
    %47 = vector.shape_cast %46 : vector<2xf32> to vector<2x1xf32>
    %48 = math.sqrt %47 : vector<2x1xf32>
    %cst_18 = arith.constant 9.99999971E-10 : f32
    %49 = vector.broadcast %cst_18 : f32 to vector<2x1xf32>
    %50 = arith.addf %48, %49 : vector<2x1xf32>
    %cst_19 = arith.constant 1.000000e+00 : f32
    %51 = vector.broadcast %cst_19 : f32 to vector<2x1xf32>
    %52 = arith.divf %51, %50 : vector<2x1xf32>
    %53 = vector.broadcast %52 : vector<2x1xf32> to vector<2x1024xf32>
    %54 = arith.mulf %44, %53 : vector<2x1024xf32>
    %c1_i32 = arith.constant 1 : i32
    %cst_20 = arith.constant dense<0.000000e+00> : vector<2x10xf32>
    %55 = tpu.matmul %54, %1, %cst_20 {dimension_numbers = #tpu.dot_dimension_numbers<[1], [1], [0], [0], [0, 0, 1, 0], [], []>} : vector<2x1024xf32>, vector<10x1024xf32>, vector<2x10xf32> -> vector<2x10xf32>
    %cst_21 = arith.constant 1.000000e+01 : f32
    %56 = vector.broadcast %cst_21 : f32 to vector<2x10xf32>
    %57 = arith.mulf %56, %55 : vector<2x10xf32>
    %58 = arith.addf %5, %57 : vector<2x10xf32>
    %cst_22 = arith.constant dense<0xFF800000> : vector<2xf32>
    %59 = vector.multi_reduction <maximumf>, %58, %cst_22 [1] : vector<2x10xf32> to vector<2xf32>
    %60 = vector.shape_cast %59 : vector<2xf32> to vector<2x1xf32>
    %61 = vector.broadcast %60 : vector<2x1xf32> to vector<2x10xf32>
    %62 = arith.subf %58, %61 : vector<2x10xf32>
    %63 = math.exp %62 : vector<2x10xf32>
    %cst_23 = arith.constant dense<0.000000e+00> : vector<2xf32>
    %64 = vector.multi_reduction <add>, %63, %cst_23 [1] : vector<2x10xf32> to vector<2xf32>
    %65 = vector.shape_cast %64 : vector<2xf32> to vector<2x1xf32>
    %66 = math.log %65 : vector<2x1xf32>
    %67 = vector.broadcast %66 : vector<2x1xf32> to vector<2x10xf32>
    %68 = arith.subf %62, %67 : vector<2x10xf32>
    %69 = math.exp %68 : vector<2x10xf32>
    %70 = arith.subf %69, %16 : vector<2x10xf32>
    %cst_24 = arith.constant dense<0.000000e+00> : vector<2x1024xf32>
    %71 = tpu.matmul %70, %1, %cst_24 {dimension_numbers = #tpu.dot_dimension_numbers<[1], [0], [0], [1], [0, 0, 1, 1], [], []>} : vector<2x10xf32>, vector<10x1024xf32>, vector<2x1024xf32> -> vector<2x1024xf32>
    %72 = arith.mulf %71, %71 : vector<2x1024xf32>
    %cst_25 = arith.constant dense<0.000000e+00> : vector<2xf32>
    %73 = vector.multi_reduction <add>, %72, %cst_25 [1] : vector<2x1024xf32> to vector<2xf32>
    %74 = vector.shape_cast %73 : vector<2xf32> to vector<2x1xf32>
    %75 = math.sqrt %74 : vector<2x1xf32>
    %cst_26 = arith.constant 9.99999971E-10 : f32
    %76 = vector.broadcast %cst_26 : f32 to vector<2x1xf32>
    %77 = arith.addf %75, %76 : vector<2x1xf32>
    %cst_27 = arith.constant 1.000000e+00 : f32
    %78 = vector.broadcast %cst_27 : f32 to vector<2x1xf32>
    %79 = arith.divf %78, %77 : vector<2x1xf32>
    %80 = vector.broadcast %79 : vector<2x1xf32> to vector<2x1024xf32>
    %81 = arith.mulf %71, %80 : vector<2x1024xf32>
    %cst_28 = arith.constant 2.000000e+00 : f32
    %82 = vector.broadcast %cst_28 : f32 to vector<2x1024xf32>
    %83 = arith.mulf %81, %82 : vector<2x1024xf32>
    %c0_29 = arith.constant 0 : index
    %c0_30 = arith.constant 0 : index
    %84 = vector.load %arg4[%c0_29, %c0_30] : memref<2x1024xf32, #tpu.memory_space<vmem>>, vector<2x1024xf32>
    tpu.vector_store %arg4[%c0_29, %c0_30], %83 {strides = array<i32>} : memref<2x1024xf32, #tpu.memory_space<vmem>>, vector<2x1024xf32>,
    %cst_31 = arith.constant dense<0.000000e+00> : vector<2x10xf32>
    %85 = tpu.matmul %81, %1, %cst_31 {dimension_numbers = #tpu.dot_dimension_numbers<[1], [1], [0], [0], [0, 0, 1, 0], [], []>} : vector<2x1024xf32>, vector<10x1024xf32>, vector<2x10xf32> -> vector<2x10xf32>
    %cst_32 = arith.constant 2.000000e+00 : f32
    %86 = vector.broadcast %cst_32 : f32 to vector<2x10xf32>
    %87 = arith.mulf %86, %85 : vector<2x10xf32>
    %88 = arith.addf %5, %87 : vector<2x10xf32>
    %cst_33 = arith.constant dense<0xFF800000> : vector<2xf32>
    %89 = vector.multi_reduction <maximumf>, %88, %cst_33 [1] : vector<2x10xf32> to vector<2xf32>
    %90 = vector.shape_cast %89 : vector<2xf32> to vector<2x1xf32>
    %91 = vector.broadcast %90 : vector<2x1xf32> to vector<2x10xf32>
    %92 = arith.subf %88, %91 : vector<2x10xf32>
    %93 = math.exp %92 : vector<2x10xf32>
    %cst_34 = arith.constant dense<0.000000e+00> : vector<2xf32>
    %94 = vector.multi_reduction <add>, %93, %cst_34 [1] : vector<2x10xf32> to vector<2xf32>
    %95 = vector.shape_cast %94 : vector<2xf32> to vector<2x1xf32>
    %96 = math.log %95 : vector<2x1xf32>
    %97 = vector.broadcast %96 : vector<2x1xf32> to vector<2x10xf32>
    %98 = arith.subf %92, %97 : vector<2x10xf32>
    %99 = arith.subf %15, %98 : vector<2x10xf32>
    %100 = arith.mulf %16, %99 : vector<2x10xf32>
    %cst_35 = arith.constant dense<0.000000e+00> : vector<2xf32>
    %101 = vector.multi_reduction <add>, %100, %cst_35 [1] : vector<2x10xf32> to vector<2xf32>
    %102 = vector.shape_cast %101 : vector<2xf32> to vector<2x1xf32>
    %cst_36 = arith.constant dense<0.000000e+00> : vector<1xf32>
    %103 = vector.multi_reduction <add>, %102, %cst_36 [0] : vector<2x1xf32> to vector<1xf32>
    %104 = vector.shape_cast %103 : vector<1xf32> to vector<1x1xf32>
    %cst_37 = arith.constant 5.000000e-01 : f32
    %105 = vector.broadcast %cst_37 : f32 to vector<1x1xf32>
    %106 = arith.mulf %104, %105 : vector<1x1xf32>
    %c0_38 = arith.constant 0 : index
    %c0_39 = arith.constant 0 : index
    %107 = vector.load %arg5[%c0_38, %c0_39] : memref<1x1xf32, #tpu.memory_space<vmem>>, vector<1x1xf32>
    tpu.vector_store %arg5[%c0_38, %c0_39], %106 {strides = array<i32>} : memref<1x1xf32, #tpu.memory_space<vmem>>, vector<1x1xf32>,
    return
  }
}

</mosaic_0001>

<bundles_post_ra>
// kernel: tpu_custom_call.1
= control target key start
LH: loop header
LB: loop body
LE: loop exit
PB: predicated region body
PF: predicated region fallthrough
CT: control target
= control target key end

     0   :  { %11 = vsyncpa [#allocation3], 0  ;;  %s2854_s0 = inlined_call_operand.hbm [shape: f32[2,1024], index: 0, kind: input, shape index: {}]   ;;  %s2855_s1 = inlined_call_operand.hbm [shape: f32[2,1024], index: 1, kind: input, shape index: {}]   ;;  %s2856_s2 = inlined_call_operand.hbm [shape: f32[10,1024], index: 2, kind: input, shape index: {}]   ;;  %s2857_s3 = inlined_call_operand.vmem [shape: f32[1,10], index: 3, kind: input, shape index: {}]   ;;  %s2858_s4 = inlined_call_operand.hbm [shape: f32[2,1024], index: 4, kind: output, shape index: {0}]   ;;  %s2859_s5 = inlined_call_operand.hbm [shape: f32[1,1], index: 5, kind: output, shape index: {1}]  }
   0x1   :  { %12 = vsyncpa [#allocation6], 0 }
   0x2   :  { %13 = vsyncpa [#allocation4], 0 }
   0x3   :  { %14 = vsyncpa [#allocation10], 0  ;;  %s2551_s18 = smov [#allocation5]   ;;  %s2552_s20 = smov [#allocation2]  }
   0x4   :  { %s31_s19 = sshll.u32 %s2551_s18, 4  ;;  %s21_s21 = sshll.u32 %s2552_s20, 4  ;;  %s32_s19 = int_to_ptr.vmem [resolvable:$true] %s31_s19  ;;  %s22_s21 = int_to_ptr.vmem [resolvable:$true] %s21_s21 }
   0x5   :  { %s2433_s24 = scalar_lea.hbm %s2855_s1, 256 }
   0x6   :  { %p2434_p0 = scmp.ne.s32.totalorder %s2855_s1, %s2433_s24  ;;  %p2437_p1 = scmp.lt.u32.totalorder %s2433_s24, %s2855_s1 }
   0x8   :  { %p2439_p2 = pnand %p2437_p1, %p2434_p0 }
   0xa   :  { %2442 = shalt.err (!%p2439_p2)
}
   0xb   :  { %s2443_s29 = scalar_lea.vmem %s32_s19, 256  ;;  %p2448_p4 = scmp.lt.s32.totalorder %s32_s19, %s32_s19 }
   0xc   :  { %p2444_p3 = scmp.ne.s32.totalorder %s32_s19, %s2443_s29  ;;  %p2449_p5 = scmp.lt.s32.totalorder %s2443_s29, %s2443_s29 }
   0xe   :  { %p2450_p6 = por %p2449_p5, %p2448_p4 }
  0x10   :  { %p2451_p7 = pnand %p2450_p6, %p2444_p3 }
  0x12   :  { %2454 = shalt.err (!%p2451_p7)
}
  0x13   :  { %34 = dma.hbm_to_vmem [thread:$0]  %s2855_s1, 256, %s32_s19, [#allocation6]  }
  0x14   :  { %s2455_s9 = scalar_lea.hbm %s2854_s0, 256 }
  0x15   :  { %p2456_p8 = scmp.ne.s32.totalorder %s2854_s0, %s2455_s9  ;;  %p2459_p9 = scmp.lt.u32.totalorder %s2455_s9, %s2854_s0 }
  0x17   :  { %p2461_p10 = pnand %p2459_p9, %p2456_p8 }
  0x19   :  { %2464 = shalt.err (!%p2461_p10)
}
  0x1a   :  { %s2465_s14 = scalar_lea.vmem %s22_s21, 256  ;;  %p2470_p12 = scmp.lt.s32.totalorder %s22_s21, %s22_s21 }
  0x1b   :  { %p2466_p11 = scmp.ne.s32.totalorder %s22_s21, %s2465_s14  ;;  %p2471_p13 = scmp.lt.s32.totalorder %s2465_s14, %s2465_s14 }
  0x1d   :  { %p2472_p0 = por %p2471_p13, %p2470_p12 }
  0x1f   :  { %p2473_p1 = pnand %p2472_p0, %p2466_p11 }
  0x21   :  { %2476 = shalt.err (!%p2473_p1)
}
  0x22   :  { %24 = dma.hbm_to_vmem [thread:$0]  %s2854_s0, 256, %s22_s21, [#allocation3]  }
  0x23   :  { %s2553_s16 = smov [#allocation7]   ;;  %s2477_s20 = scalar_lea.hbm %s2856_s2, 2048 }
  0x24   :  { %s40_s17 = sshll.u32 %s2553_s16, 4  ;;  %p2478_p2 = scmp.ne.s32.totalorder %s2856_s2, %s2477_s20  ;;  %s41_s17 = int_to_ptr.vmem [resolvable:$true] %s40_s17 }
  0x25   :  { %p2481_p3 = scmp.lt.u32.totalorder %s2477_s20, %s2856_s2 }
  0x27   :  { %p2483_p4 = pnand %p2481_p3, %p2478_p2 }
  0x29   :  { %2486 = shalt.err (!%p2483_p4)
}
  0x2a   :  { %s2487_s26 = scalar_lea.vmem %s41_s17, 2048  ;;  %p2492_p6 = scmp.lt.s32.totalorder %s41_s17, %s41_s17 }
  0x2b   :  { %p2488_p5 = scmp.ne.s32.totalorder %s41_s17, %s2487_s26  ;;  %p2493_p7 = scmp.lt.s32.totalorder %s2487_s26, %s2487_s26 }
  0x2d   :  { %p2494_p8 = por %p2493_p7, %p2492_p6 }
  0x2f   :  { %p2495_p9 = pnand %p2494_p8, %p2488_p5 }
  0x31   :  { %2498 = shalt.err (!%p2495_p9)
}
  0x32   :  { %s2554_s0 = smov 1024   ;;  %s2555_s21 = smov 64  }
  0x33   :  { %46 = dma.hbm_to_vmem [thread:$0]  %s2856_s2, 2048, %s41_s17, [#allocation6], %s2554_s0, %s2554_s0, %s2555_s21  }
  0x34   :  { %2543 = dma.done.wait [#allocation3], 256  }
  0x35   :  { %2544 = vsyncadd [#allocation3], 4294967040 }
  0x36   :  { %2545 = dma.done.wait [#allocation6], 2304  }
  0x37   :  { %2546 = vsyncadd [#allocation6], 4294964992  ;;  %v89_v0 = vlaneseq  ;;  %v2556_v1 = vmov 1983009808   ;;  %v61_v5 = vld [vmem:[#allocation7 + $0x8] sm:$0xff]  ;;  %v60_v7 = vld [vmem:[#allocation7] sm:$0xff] }
  0x38   :  { %v87_v2 = vunpack.c.l.s4 %v2556_v1  ;;  %v69_v6 = vld [vmem:[#allocation7 + $0x48] sm:$0x3]  ;;  %v68_v10 = vld [vmem:[#allocation7 + $0x40] sm:$0x3]  ;;  %v63_v12 = vld [vmem:[#allocation7 + $0x18] sm:$0xff]  ;;  %vm470_vm0 = vcmask 1041408  }
  0x39   :  { %v2628_v4 = vshrl.u32 %v89_v0, 7  ;;  %v2633_v9 = vpack.c.bf16 %v69_v6, %v61_v5  ;;  %v58_v11 = vld [vmem:[#allocation2] sm:$0xff]  ;;  %v2635_v13 = vpack.c.bf16 %v68_v10, %v60_v7  ;;  %v71_v16 = vld [vmem:[#allocation7 + $0x58] sm:$0x3]  ;;  %v2638_v17 = vld [vmem:[#allocation5] sm:$0xff]  ;;  %vm407_vm3 = vcmask 74752  }
  0x3a   :  { %v88_v3 = vunpack.c.0.s8 %v87_v2  ;;  %v85_v14 = vcombine.high %v58_v11, %v58_v11  ;;  %v2640_v18 = vld [vmem:[#allocation5 + $0x8] sm:$0xff]  ;;  %v2643_v19 = vpack.c.bf16 %v71_v16, %v63_v12  ;;  %v424_v20 = vmul.f32 %v2638_v17, %v2638_v17  ;;  %v62_v22 = vld [vmem:[#allocation7 + $0x10] sm:$0xff]  ;;  %v65_v26 = vld [vmem:[#allocation7 + $0x28] sm:$0xff] }
  0x3b   :  { %2251 = vmatprep.subr.bf16.mxu0 %v2633_v9  ;;  %v425_v21 = vmul.f32 %v2640_v18, %v2640_v18  ;;  %v70_v23 = vld [vmem:[#allocation7 + $0x50] sm:$0x3]  ;;  %v73_v27 = vld [vmem:[#allocation7 + $0x68] sm:$0x3]  ;;  %v64_v49 = vld [vmem:[#allocation7 + $0x20] sm:$0xff]  ;;  %vm2558_vm4 = vmmov 1  }
  0x3c   :  { %v2631_v8 = vsub.s32 %v88_v3, %v2628_v4  ;;  %2253 = vmatpush1.bf16.xpose.msra.mxu0 %v2635_v13  ;;  %v428_v28 = vcombine.high %v424_v20, %v424_v20  ;;  %v2653_v31 = vpack.c.bf16 %v70_v23, %v62_v22  ;;  %v2657_v35 = vpack.c.bf16 %v73_v27, %v65_v26  ;;  %v59_v41 = vld [vmem:[#allocation2 + $0x8] sm:$0xff]  ;;  %v72_v50 = vld [vmem:[#allocation7 + $0x60] sm:$0x3]  ;;  %v67_v52 = vld [vmem:[#allocation7 + $0x38] sm:$0xff] }
  0x3d   :  { %2255 = vmatprep.subr.bf16.mxu0 %v2643_v19  ;;  %v445_v30 = vcombine.high %v425_v21, %v425_v21  ;;  %2271 = vmatprep.subr.bf16.mxu1 %v2643_v19  ;;  %v75_v53 = vld [vmem:[#allocation7 + $0x78] sm:$0x3]  ;;  %v2672_v57 = vpack.c.bf16 %v72_v50, %v64_v49  ;;  %v102_v59 = vcombine.high %v59_v41, %v59_v41  ;;  %v66_v2 = vld [vmem:[#allocation7 + $0x30] sm:$0xff]  ;;  %vm2709_vm5 = vmpackc.low %vm470_vm0, %vm2558_vm4  ;;  %vm850_vm6 = vcmask 80896  }
  0x3e   :  { %v92_v15 = vrot.slane %v58_v11, %v2631_v8  ;;  %v99_v25 = vrot.slane %v85_v14, %v2631_v8  ;;  %v435_v29 = vrot.slane %v424_v20, %v2631_v8  ;;  %v442_v32 = vrot.slane %v428_v28, %v2631_v8  ;;  %2273 = vmatpush1.bf16.xpose.msra.mxu1 %v2653_v31  ;;  %v74_v3 = vld [vmem:[#allocation7 + $0x70] sm:$0x3] }
  0x3f   :  { %v452_v34 = vrot.slane %v425_v21, %v2631_v8  ;;  %2275 = vmatprep.subr.bf16.mxu1 %v2657_v35  ;;  %v459_v43 = vrot.slane %v445_v30, %v2631_v8  ;;  %v109_v47 = vrot.slane %v59_v41, %v2631_v8  ;;  %v2675_v61 = vpack.c.bf16 %v75_v53, %v67_v52 }
  0x40   :  { %v100_v24 = vcombine.high %v92_v15, %v92_v15  ;;  %v443_v33 = vcombine.high %v435_v29, %v435_v29  ;;  %v471_v36 = vsel %vm470_vm0, %v435_v29, 0.0  ;;  %v101_v37 = vcombine.high %v99_v25, %v99_v25 }
  0x41   :  { %v444_v38 = vcombine.high %v442_v32, %v442_v32  ;;  %v474_v40 = vsel %vm470_vm0, %v442_v32, 0.0  ;;  %v460_v44 = vcombine.high %v452_v34, %v452_v34  ;;  %v478_v48 = vsel %vm470_vm0, %v452_v34, 0.0 }
  0x42   :  { %191 = vmatprep.mubr.f32.mxu0 %v100_v24  ;;  %v472_v39 = vsel %vm470_vm0, %v443_v33, 0.0  ;;  %v461_v54 = vcombine.high %v459_v43, %v459_v43  ;;  %v117_v58 = vcombine.high %v109_v47, %v109_v47  ;;  %v482_v60 = vsel %vm470_vm0, %v459_v43, 0.0 }
  0x43   :  { %v473_v42 = vadd.f32 %v472_v39, %v471_v36  ;;  %192 = vmatmul.mubr.f32.vlgmr.msra.gmra.mrb[0].mxu0 %v92_v15  ;;  %v476_v45 = vsel %vm470_vm0, %v444_v38, 0.0  ;;  %v480_v55 = vsel %vm470_vm0, %v460_v44, 0.0  ;;  %v116_v1 = vrot.slane %v102_v59, %v2631_v8  ;;  %v2225_v38 = vld [vmem:[%s2857_s3] ss:$0 sm:$0xff]  ;;  %s2560_s3 = smov [#allocation8]  }
  0x44   :  { %2257 = vmatpush1.bf16.xpose.msra.mxu0 %v2653_v31  ;;  %261 = vmatprep.mubr.f32.mxu0 %v101_v37  ;;  %v484_v63 = vsel %vm470_vm0, %v461_v54, 0.0  ;;  %v2681_v6 = vpack.c.bf16 %v74_v3, %v66_v2  ;;  %v2557_v21 = vmov 269488144   ;;  %s2201_s30 = sshll.u32 %s2560_s3, 4  ;;  %s2202_s30 = int_to_ptr.vmem [resolvable:$true] %s2201_s30 }
  0x45   :  { %v475_v46 = vadd.f32 %v474_v40, %v473_v42  ;;  %2259 = vmatprep.subr.bf16.mxu0 %v2657_v35  ;;  %v118_v7 = vcombine.high %v116_v1, %v116_v1  ;;  %v500_v22 = vunpack.c.l.s4 %v2557_v21  ;;  %s2499_s6 = scalar_lea.vmem %s2202_s30, 256  ;;  %p2504_p11 = scmp.lt.s32.totalorder %s2202_s30, %s2202_s30 }
  0x46   :  { %p2500_p10 = scmp.ne.s32.totalorder %s2202_s30, %s2499_s6  ;;  %p2505_p12 = scmp.lt.s32.totalorder %s2499_s6, %s2499_s6 }
  0x47   :  { %v477_v51 = vadd.f32 %v476_v45, %v475_v46  ;;  %v501_v23 = vunpack.c.0.s8 %v500_v22 }
  0x48   :  { %p2506_p13 = por %p2505_p12, %p2504_p11 }
  0x49   :  { %v479_v56 = vadd.f32 %v478_v48, %v477_v51  ;;  %v504_v24 = vsub.s32 %v501_v23, %v2628_v4 }
  0x4a   :  { %p2507_p0 = pnand %p2506_p13, %p2500_p10 }
  0x4b   :  { %v481_v62 = vadd.f32 %v480_v55, %v479_v56  ;;  %262 = vmatmul.mubr.f32.vlgmr.msra.gmra.mrb[0].mxu0 %v99_v25 }
  0x4c   :  { %2261 = vmatpush1.bf16.xpose.msra.mxu0 %v2672_v57  ;;  %331 = vmatprep.mubr.f32.mxu0 %v117_v58 }
  0x4d   :  { %v483_v0 = vadd.f32 %v482_v60, %v481_v62  ;;  %2263 = vmatprep.subr.bf16.mxu0 %v2675_v61 }
  0x4f   :  { %v485_v5 = vadd.f32 %v484_v63, %v483_v0  ;;  %v2559_v0 = vmov 0.0  }
  0x51   :  { %486 = vadd.xlane.f32.xlu0 %v485_v5 }
  0x53   :  { %332 = vmatmul.mubr.f32.vlgmr.msra.gmra.mrb[0].mxu0 %v109_v47 }
  0x54   :  { %2265 = vmatpush1.bf16.xpose.msra.mxu0 %v2681_v6  ;;  %401 = vmatprep.mubr.f32.mxu0 %v118_v7 }
  0x55   :  { %2267 = vmatprep.subr.bf16.mxu0 %v2633_v9 }
  0x5b   :  { %402 = vmatmul.mubr.f32.vlgmr.msra.gmra.mrb[0].mxu0 %v116_v1 }
  0x5c   :  { %2269 = vmatpush1.bf16.xpose.msra.mxu0 %v2635_v13 }
  0x5d   :  { %2284 = vmatprep.subr.msk.bf16.mxu0 %vm2709_vm5, %v2633_v9 }
  0xde   :  { %v487_v10 = vpop.xlane.xlu0 %486 }
  0xdf   :  { %2399 = vrsqrt.f32 %v487_v10  ;;  %vm490_vm1 = vcmp.eq.f32.partialorder %v487_v10, inf  ;;  %v493_v14 = vand.u32 2147483648, %v487_v10  ;;  %vm492_vm2 = vcmp.eq.f32.partialorder %v487_v10, 0.0 }
  0xe9   :  { %v2400_v11 = vpop.eup %2399 }
  0xea   :  { %v489_v12 = vmul.f32 %v2400_v11, %v487_v10 }
  0xec   :  { %v491_v15 = vsel %vm490_vm1, %v487_v10, %v489_v12 }
  0xed   :  { %v494_v16 = vsel %vm492_vm2, %v493_v14, %v491_v15 }
  0xee   :  { %v495_v20 = vadd.f32 1e-09, %v494_v16 }
  0xf0   :  { %2401 = vrcp.f32 %v495_v20 }
  0xfa   :  { %v2402_v25 = vpop.eup %2401 }
  0xfb   :  { %v505_v26 = vrot.slane %v2402_v25, %v504_v24 }
  0xfd   :  { %v507_v27 = vmul.f32 %v505_v26, %v2638_v17  ;;  %v508_v28 = vmul.f32 %v505_v26, %v2640_v18 }
  0xff   :  { %v518_v29 = vrot.slane %v507_v27, %v2631_v8  ;;  %v511_v30 = vcombine.high %v507_v27, %v507_v27  ;;  %v535_v34 = vrot.slane %v508_v28, %v2631_v8  ;;  %v528_v4 = vcombine.high %v508_v28, %v508_v28 }
 0x101   :  { %v526_v32 = vcombine.high %v518_v29, %v518_v29  ;;  %v525_v33 = vrot.slane %v511_v30, %v2631_v8  ;;  %v543_v37 = vcombine.high %v535_v34, %v535_v34  ;;  %v542_v17 = vrot.slane %v528_v4, %v2631_v8 }
 0x103   :  { %617 = vmatprep.mubr.f32.mxu0 %v526_v32  ;;  %v527_v36 = vcombine.high %v525_v33, %v525_v33  ;;  %v544_v18 = vcombine.high %v542_v17, %v542_v17 }
 0x104   :  { %618 = vmatmul.mubr.f32.vlgmr.msra.gmra.mrb[2].mxu0 %v518_v29 }
 0x105   :  { %687 = vmatprep.mubr.f32.mxu1 %v527_v36  ;;  %942 = vmatprep.mubr.f32.mxu0 %v2559_v0 }
 0x106   :  { %688 = vmatmul.mubr.f32.vlgmr.msra.gmra.mrb[0].mxu1 %v525_v33  ;;  %2287 = vmatpush1.bf16.msk.msra.mxu0 %vm2709_vm5, %v2635_v13 }
 0x107   :  { %2277 = vmatpush1.bf16.xpose.msra.mxu1 %v2672_v57  ;;  %757 = vmatprep.mubr.f32.mxu1 %v543_v37 }
 0x108   :  { %2279 = vmatprep.subr.bf16.mxu1 %v2675_v61  ;;  %2296 = vmatprep.subr.msk.bf16.mxu0 %vm2709_vm5, %v2657_v35 }
 0x10e   :  { %758 = vmatmul.mubr.f32.vlgmr.msra.gmra.mrb[0].mxu1 %v535_v34 }
 0x10f   :  { %2281 = vmatpush1.bf16.xpose.msra.mxu1 %v2681_v6  ;;  %827 = vmatprep.mubr.f32.mxu1 %v544_v18 }
 0x110   :  { %2290 = vmatprep.subr.msk.bf16.mxu1 %vm2709_vm5, %v2643_v19 }
 0x116   :  { %828 = vmatmul.mubr.f32.vlgmr.msra.gmra.mrb[0].mxu1 %v542_v17 }
 0x117   :  { %1013 = vmatprep.mubr.f32.mxu1 %v2559_v0  ;;  %2293 = vmatpush1.bf16.msk.msra.mxu1 %vm2709_vm5, %v2653_v31 }
 0x118   :  { %2302 = vmatprep.subr.msk.bf16.mxu1 %vm2709_vm5, %v2675_v61 }
 0x12e   :  { %v403_v39 = vpop.f32.mrb[0].mxu0 }
 0x12f   :  { %v2699_v40 = vadd.f32 %v2225_v38, %v403_v39  ;;  %v405_v41 = vpop.f32.mrb[1].mxu0 }
 0x131   :  { %v408_v42 = vsel %vm407_vm3, %v2699_v40, -inf }
 0x132   :  { %409 = vmax.xlane.f32.xlu0 %v408_v42 }
 0x1bf   :  { %v410_v45 = vpop.xlane.xlu0 %409 }
 0x1c0   :  { %v411_v46 = vsub.f32 %v2699_v40, %v410_v45 }
 0x1c2   :  { %v412_v47 = vmul.f32 1.442695, %v411_v46 }
 0x1c4   :  { %2403 = vpow2.f32 %v412_v47 }
 0x1ce   :  { %v2404_v54 = vpop.eup %2403 }
 0x1cf   :  { %v414_v55 = vsel %vm407_vm3, %v2404_v54, 0.0 }
 0x1d7   :  { %v619_v43 = vpop.f32.mrb[2].mxu0 }
 0x1d8   :  { %v621_v44 = vpop.f32.mrb[3].mxu0 }
 0x1e9   :  { %v829_v48 = vpop.f32.mrb[0].mxu1 }
 0x1ea   :  { %v2363_v49 = vadd.f32 %v829_v48, %v619_v43  ;;  %v831_v50 = vpop.f32.mrb[1].mxu1 }
 0x1ec   :  { %v833_v51 = vmul.f32 10.0, %v2363_v49 }
 0x1ee   :  { %v834_v52 = vadd.f32 %v2699_v40, %v833_v51 }
 0x1f0   :  { %v835_v53 = vsel %vm407_vm3, %v834_v52, -inf }
 0x1f1   :  { %836 = vmax.xlane.f32.xlu1 %v835_v53 }
 0x1f5   :  { %415 = vadd.xlane.f32.xlu1 %v414_v55 }
 0x27e   :  { %v837_v56 = vpop.xlane.xlu1 %836 }
 0x27f   :  { %v838_v58 = vsub.f32 %v834_v52, %v837_v56 }
 0x281   :  { %v839_v59 = vmul.f32 1.442695, %v838_v58 }
 0x282   :  { %v416_v1 = vpop.xlane.xlu1 %415 }
 0x283   :  { %2405 = vpow2.f32 %v839_v59 }
 0x284   :  { %2407 = vlog2.f32 %v416_v1 }
 0x28d   :  { %v2406_v60 = vpop.eup %2405 }
 0x28e   :  { %v841_v62 = vsel %vm407_vm3, %v2406_v60, 0.0  ;;  %v2408_v3 = vpop.eup %2407 }
 0x28f   :  { %842 = vadd.xlane.f32.xlu0 %v841_v62  ;;  %v418_v5 = vmul.f32 0.6931472, %v2408_v3 }
 0x291   :  { %v2733_v7 = vsub.f32 %v411_v46, %v418_v5 }
 0x293   :  { %v420_v12 = vmul.f32 1.442695, %v2733_v7 }
 0x31c   :  { %v843_v2 = vpop.xlane.xlu0 %842 }
 0x31d   :  { %2409 = vlog2.f32 %v843_v2 }
 0x31e   :  { %2411 = vpow2.f32 %v420_v12 }
 0x327   :  { %v2410_v10 = vpop.eup %2409 }
 0x328   :  { %v845_v11 = vmul.f32 0.6931472, %v2410_v10  ;;  %v2736_v16 = vpop.eup %2411 }
 0x32a   :  { %v846_v14 = vsub.f32 %v838_v58, %v845_v11 }
 0x32c   :  { %v847_v15 = vmul.f32 1.442695, %v846_v14 }
 0x32e   :  { %2413 = vpow2.f32 %v847_v15 }
 0x338   :  { %v2414_v20 = vpop.eup %2413 }
 0x339   :  { %v849_v21 = vsub.f32 %v2414_v20, %v2736_v16 }
 0x33b   :  { %2228 = vmatmul.mubr.msk.f32.vlgmr.msra.gmra.mrb[4].mxu0 %vm850_vm6, %v849_v21  ;;  %2231 = vmatmul.mubr.msk.f32.vlgmr.msra.gmra.mrb[2].mxu1 %vm850_vm6, %v849_v21 }
 0x33c   :  { %2299 = vmatpush1.bf16.msk.msra.mxu0 %vm2709_vm5, %v2672_v57  ;;  %2305 = vmatpush1.bf16.msk.msra.mxu1 %vm2709_vm5, %v2681_v6 }
 0x33d   :  { %1084 = vmatprep.mubr.f32.mxu0 %v2559_v0  ;;  %1155 = vmatprep.mubr.f32.mxu1 %v2559_v0 }
 0x33e   :  { %2307 = vmatprep.subr.bf16.mxu0 %v2633_v9  ;;  %2324 = vmatprep.subr.msk.bf16.mxu1 %vm2709_vm5, %v2633_v9 }
 0x33f   :  { %2234 = vmatmul.mubr.msk.f32.vlgmr.msra.gmra.mrb[6].mxu0 %vm850_vm6, %v849_v21  ;;  %2237 = vmatmul.mubr.msk.f32.vlgmr.msra.gmra.mrb[4].mxu1 %vm850_vm6, %v849_v21 }
 0x340   :  { %2327 = vmatpush1.bf16.msk.msra.mxu1 %vm2709_vm5, %v2635_v13  ;;  %1569 = vmatprep.mubr.f32.mxu1 %v2559_v0 }
 0x341   :  { %2330 = vmatprep.subr.msk.bf16.mxu1 %vm2709_vm5, %v2643_v19 }
 0x345   :  { %2309 = vmatpush1.bf16.xpose.msra.mxu0 %v2635_v13 }
 0x346   :  { %2311 = vmatprep.subr.bf16.mxu0 %v2643_v19 }
 0x40e   :  { %v944_v22 = vpop.f32.mrb[4].mxu0  ;;  %v1015_v23 = vpop.f32.mrb[2].mxu1 }
 0x40f   :  { %v1162_v24 = vmul.f32 %v944_v22, %v944_v22  ;;  %v946_v25 = vpop.f32.mrb[5].mxu0  ;;  %v1017_v26 = vpop.f32.mrb[3].mxu1  ;;  %v1164_v27 = vmul.f32 %v1015_v23, %v1015_v23 }
 0x410   :  { %v1163_v28 = vmul.f32 %v946_v25, %v946_v25  ;;  %v1165_v32 = vmul.f32 %v1017_v26, %v1017_v26 }
 0x411   :  { %v1170_v29 = vsel %vm470_vm0, %v1162_v24, 0.0  ;;  %v1173_v17 = vsel %vm470_vm0, %v1164_v27, 0.0 }
 0x412   :  { %v1171_v30 = vsel %vm470_vm0, %v1163_v28, 0.0  ;;  %v1086_v33 = vpop.f32.mrb[6].mxu0  ;;  %v1157_v34 = vpop.f32.mrb[4].mxu1  ;;  %v1175_v39 = vsel %vm470_vm0, %v1165_v32, 0.0 }
 0x413   :  { %v1172_v36 = vadd.f32 %v1171_v30, %v1170_v29  ;;  %v1088_v37 = vpop.f32.mrb[7].mxu0  ;;  %v1159_v4 = vpop.f32.mrb[5].mxu1  ;;  %v1166_v18 = vmul.f32 %v1086_v33, %v1086_v33  ;;  %v1168_v44 = vmul.f32 %v1157_v34, %v1157_v34 }
 0x414   :  { %v1167_v41 = vmul.f32 %v1088_v37, %v1088_v37  ;;  %v1169_v47 = vmul.f32 %v1159_v4, %v1159_v4 }
 0x415   :  { %v1174_v38 = vadd.f32 %v1173_v17, %v1172_v36  ;;  %v1177_v43 = vsel %vm470_vm0, %v1166_v18, 0.0  ;;  %v1181_v49 = vsel %vm470_vm0, %v1168_v44, 0.0 }
 0x416   :  { %v1179_v46 = vsel %vm470_vm0, %v1167_v41, 0.0  ;;  %v1183_v51 = vsel %vm470_vm0, %v1169_v47, 0.0 }
 0x417   :  { %v1176_v42 = vadd.f32 %v1175_v39, %v1174_v38 }
 0x419   :  { %v1178_v45 = vadd.f32 %v1177_v43, %v1176_v42 }
 0x41b   :  { %v1180_v48 = vadd.f32 %v1179_v46, %v1178_v45 }
 0x41d   :  { %v1182_v50 = vadd.f32 %v1181_v49, %v1180_v48 }
 0x41f   :  { %v1184_v52 = vadd.f32 %v1183_v51, %v1182_v50 }
 0x421   :  { %1185 = vadd.xlane.f32.xlu1 %v1184_v52 }
 0x4ae   :  { %v1186_v53 = vpop.xlane.xlu1 %1185 }
 0x4af   :  { %2415 = vrsqrt.f32 %v1186_v53  ;;  %vm1189_vm7 = vcmp.eq.f32.partialorder %v1186_v53, inf  ;;  %v1192_v56 = vand.u32 2147483648, %v1186_v53  ;;  %vm1191_vm8 = vcmp.eq.f32.partialorder %v1186_v53, 0.0 }
 0x4b9   :  { %v2416_v54 = vpop.eup %2415 }
 0x4ba   :  { %v1188_v55 = vmul.f32 %v2416_v54, %v1186_v53 }
 0x4bc   :  { %v1190_v58 = vsel %vm1189_vm7, %v1186_v53, %v1188_v55 }
 0x4bd   :  { %v1193_v59 = vsel %vm1191_vm8, %v1192_v56, %v1190_v58 }
 0x4be   :  { %v1194_v60 = vadd.f32 1e-09, %v1193_v59 }
 0x4c0   :  { %2417 = vrcp.f32 %v1194_v60 }
 0x4ca   :  { %v2418_v62 = vpop.eup %2417 }
 0x4cb   :  { %v1198_v1 = vmul.f32 %v2418_v62, %v946_v25  ;;  %v1197_v2 = vmul.f32 %v2418_v62, %v944_v22  ;;  %v1200_v3 = vmul.f32 %v2418_v62, %v1017_v26  ;;  %v1199_v5 = vmul.f32 %v2418_v62, %v1015_v23 }
 0x4cc   :  { %v1202_v10 = vmul.f32 %v2418_v62, %v1088_v37  ;;  %v1201_v11 = vmul.f32 %v2418_v62, %v1086_v33  ;;  %v1204_v12 = vmul.f32 %v2418_v62, %v1159_v4  ;;  %v1203_v14 = vmul.f32 %v2418_v62, %v1157_v34 }
 0x4cd   :  { %1269 = vmatprep.mubr.f32.mxu0 %v1198_v1 }
 0x4ce   :  { %1270 = vmatmul.mubr.f32.vlgmr.msra.gmra.mrb[8].mxu0 %v1197_v2 }
 0x4cf   :  { %2313 = vmatpush1.bf16.xpose.msra.mxu0 %v2653_v31  ;;  %1339 = vmatprep.mubr.f32.mxu0 %v1200_v3 }
 0x4d0   :  { %2315 = vmatprep.subr.bf16.mxu0 %v2657_v35 }
 0x4d6   :  { %1340 = vmatmul.mubr.f32.vlgmr.msra.gmra.mrb[8].mxu0 %v1199_v5 }
 0x4d7   :  { %2317 = vmatpush1.bf16.xpose.msra.mxu0 %v2672_v57  ;;  %1409 = vmatprep.mubr.f32.mxu0 %v1202_v10 }
 0x4d8   :  { %2319 = vmatprep.subr.bf16.mxu0 %v2675_v61 }
 0x4de   :  { %1410 = vmatmul.mubr.f32.vlgmr.msra.gmra.mrb[8].mxu0 %v1201_v11 }
 0x4df   :  { %2321 = vmatpush1.bf16.xpose.msra.mxu0 %v2681_v6  ;;  %1479 = vmatprep.mubr.f32.mxu0 %v1204_v12 }
 0x4e6   :  { %1480 = vmatmul.mubr.f32.vlgmr.msra.gmra.mrb[8].mxu0 %v1203_v14 }
 0x5b9   :  { %v1481_v15 = vpop.f32.mrb[8].mxu0 }
 0x5ba   :  { %v1485_v20 = vmul.f32 10.0, %v1481_v15  ;;  %v1483_v21 = vpop.f32.mrb[9].mxu0 }
 0x5bc   :  { %v1486_v22 = vadd.f32 %v2699_v40, %v1485_v20 }
 0x5be   :  { %v1487_v23 = vsel %vm407_vm3, %v1486_v22, -inf }
 0x5bf   :  { %1488 = vmax.xlane.f32.xlu0 %v1487_v23 }
 0x64c   :  { %v1489_v24 = vpop.xlane.xlu0 %1488 }
 0x64d   :  { %v1490_v25 = vsub.f32 %v1486_v22, %v1489_v24 }
 0x64f   :  { %v1491_v26 = vmul.f32 1.442695, %v1490_v25 }
 0x651   :  { %2419 = vpow2.f32 %v1491_v26 }
 0x65b   :  { %v2420_v27 = vpop.eup %2419 }
 0x65c   :  { %v1493_v28 = vsel %vm407_vm3, %v2420_v27, 0.0 }
 0x65d   :  { %1494 = vadd.xlane.f32.xlu1 %v1493_v28 }
 0x6ea   :  { %v1495_v29 = vpop.xlane.xlu1 %1494 }
 0x6eb   :  { %2421 = vlog2.f32 %v1495_v29 }
 0x6f5   :  { %v2422_v30 = vpop.eup %2421 }
 0x6f6   :  { %v1497_v32 = vmul.f32 0.6931472, %v2422_v30 }
 0x6f8   :  { %v1498_v33 = vsub.f32 %v1490_v25, %v1497_v32 }
 0x6fa   :  { %v1499_v34 = vmul.f32 1.442695, %v1498_v33 }
 0x6fc   :  { %2423 = vpow2.f32 %v1499_v34 }
 0x706   :  { %v2424_v36 = vpop.eup %2423 }
 0x707   :  { %v1501_v37 = vsub.f32 %v2424_v36, %v2736_v16 }
 0x709   :  { %2240 = vmatmul.mubr.msk.f32.vlgmr.msra.gmra.mrb[6].mxu1 %vm850_vm6, %v1501_v37 }
 0x70a   :  { %2333 = vmatpush1.bf16.msk.msra.mxu1 %vm2709_vm5, %v2653_v31  ;;  %1640 = vmatprep.mubr.f32.mxu1 %v2559_v0 }
 0x70b   :  { %2336 = vmatprep.subr.msk.bf16.mxu1 %vm2709_vm5, %v2657_v35 }
 0x70d   :  { %2243 = vmatmul.mubr.msk.f32.vlgmr.msra.gmra.mrb[8].mxu1 %vm850_vm6, %v1501_v37 }
 0x70e   :  { %2339 = vmatpush1.bf16.msk.msra.mxu1 %vm2709_vm5, %v2672_v57  ;;  %1711 = vmatprep.mubr.f32.mxu1 %v2559_v0 }
 0x70f   :  { %2342 = vmatprep.subr.msk.bf16.mxu1 %vm2709_vm5, %v2675_v61 }
 0x711   :  { %2246 = vmatmul.mubr.msk.f32.vlgmr.msra.gmra.mrb[10].mxu1 %vm850_vm6, %v1501_v37 }
 0x712   :  { %2345 = vmatpush1.bf16.msk.msra.mxu1 %vm2709_vm5, %v2681_v6  ;;  %1782 = vmatprep.mubr.f32.mxu1 %v2559_v0 }
 0x713   :  { %2347 = vmatprep.subr.bf16.mxu1 %v2633_v9 }
 0x715   :  { %2249 = vmatmul.mubr.msk.f32.vlgmr.msra.gmra.mrb[12].mxu1 %vm850_vm6, %v1501_v37 }
 0x71b   :  { %2349 = vmatpush1.bf16.xpose.msra.mxu1 %v2635_v13 }
 0x71c   :  { %2351 = vmatprep.subr.bf16.mxu1 %v2643_v19 }
 0x7dc   :  { %v1571_v4 = vpop.f32.mrb[6].mxu1 }
 0x7dd   :  { %v1789_v17 = vmul.f32 %v1571_v4, %v1571_v4  ;;  %v1573_v18 = vpop.f32.mrb[7].mxu1 }
 0x7de   :  { %v1790_v38 = vmul.f32 %v1573_v18, %v1573_v18 }
 0x7df   :  { %v1797_v39 = vsel %vm470_vm0, %v1789_v17, 0.0 }
 0x7e0   :  { %v1798_v41 = vsel %vm470_vm0, %v1790_v38, 0.0  ;;  %v1642_v63 = vpop.f32.mrb[8].mxu1 }
 0x7e1   :  { %v1799_v42 = vadd.f32 %v1798_v41, %v1797_v39  ;;  %v1791_v43 = vmul.f32 %v1642_v63, %v1642_v63  ;;  %v1644_v0 = vpop.f32.mrb[9].mxu1 }
 0x7e2   :  { %v1792_v44 = vmul.f32 %v1644_v0, %v1644_v0 }
 0x7e3   :  { %v1800_v9 = vsel %vm470_vm0, %v1791_v43, 0.0 }
 0x7e4   :  { %v1801_v45 = vadd.f32 %v1800_v9, %v1799_v42  ;;  %v1802_v13 = vsel %vm470_vm0, %v1792_v44, 0.0  ;;  %v1713_v46 = vpop.f32.mrb[10].mxu1 }
 0x7e5   :  { %v1793_v19 = vmul.f32 %v1713_v46, %v1713_v46  ;;  %v1715_v47 = vpop.f32.mrb[11].mxu1 }
 0x7e6   :  { %v1803_v48 = vadd.f32 %v1802_v13, %v1801_v45  ;;  %v1794_v49 = vmul.f32 %v1715_v47, %v1715_v47 }
 0x7e7   :  { %v1804_v50 = vsel %vm470_vm0, %v1793_v19, 0.0 }
 0x7e8   :  { %v1805_v51 = vadd.f32 %v1804_v50, %v1803_v48  ;;  %v1806_v52 = vsel %vm470_vm0, %v1794_v49, 0.0  ;;  %v1784_v53 = vpop.f32.mrb[12].mxu1 }
 0x7e9   :  { %v1795_v54 = vmul.f32 %v1784_v53, %v1784_v53  ;;  %v1786_v55 = vpop.f32.mrb[13].mxu1 }
 0x7ea   :  { %v1807_v56 = vadd.f32 %v1806_v52, %v1805_v51  ;;  %v1796_v58 = vmul.f32 %v1786_v55, %v1786_v55 }
 0x7eb   :  { %v1808_v59 = vsel %vm470_vm0, %v1795_v54, 0.0 }
 0x7ec   :  { %v1809_v60 = vadd.f32 %v1808_v59, %v1807_v56  ;;  %v1810_v62 = vsel %vm470_vm0, %v1796_v58, 0.0 }
 0x7ee   :  { %v1811_v1 = vadd.f32 %v1810_v62, %v1809_v60 }
 0x7f0   :  { %1812 = vadd.xlane.f32.xlu0 %v1811_v1 }
 0x87d   :  { %v1813_v2 = vpop.xlane.xlu0 %1812 }
 0x87e   :  { %2425 = vrsqrt.f32 %v1813_v2  ;;  %vm1816_vm9 = vcmp.eq.f32.partialorder %v1813_v2, inf  ;;  %v1819_v10 = vand.u32 2147483648, %v1813_v2  ;;  %vm1818_vm10 = vcmp.eq.f32.partialorder %v1813_v2, 0.0 }
 0x888   :  { %v2426_v3 = vpop.eup %2425 }
 0x889   :  { %v1815_v5 = vmul.f32 %v2426_v3, %v1813_v2 }
 0x88b   :  { %v1817_v11 = vsel %vm1816_vm9, %v1813_v2, %v1815_v5 }
 0x88c   :  { %v1820_v12 = vsel %vm1818_vm10, %v1819_v10, %v1817_v11 }
 0x88d   :  { %v1821_v14 = vadd.f32 1e-09, %v1820_v12 }
 0x88f   :  { %2427 = vrcp.f32 %v1821_v14 }
 0x899   :  { %v2428_v15 = vpop.eup %2427 }
 0x89a   :  { %v1825_v20 = vmul.f32 %v2428_v15, %v1573_v18  ;;  %v1824_v21 = vmul.f32 %v2428_v15, %v1571_v4  ;;  %v1827_v22 = vmul.f32 %v2428_v15, %v1644_v0  ;;  %v1826_v23 = vmul.f32 %v2428_v15, %v1642_v63 }
 0x89b   :  { %v1829_v24 = vmul.f32 %v2428_v15, %v1715_v47  ;;  %v1828_v25 = vmul.f32 %v2428_v15, %v1713_v46  ;;  %v1831_v26 = vmul.f32 %v2428_v15, %v1786_v55  ;;  %v1830_v27 = vmul.f32 %v2428_v15, %v1784_v53 }
 0x89c   :  { %v1833_v28 = vmul.f32 2.0, %v1825_v20  ;;  %1950 = vmatprep.mubr.f32.mxu1 %v1825_v20  ;;  %v1832_v29 = vmul.f32 2.0, %v1824_v21  ;;  %v1835_v30 = vmul.f32 2.0, %v1827_v22  ;;  %v1834_v32 = vmul.f32 2.0, %v1826_v23 }
 0x89d   :  { %1951 = vmatmul.mubr.f32.vlgmr.msra.gmra.mrb[14].mxu1 %v1824_v21  ;;  %v1837_v33 = vmul.f32 2.0, %v1829_v24  ;;  %v1836_v34 = vmul.f32 2.0, %v1828_v25  ;;  %v1839_v36 = vmul.f32 2.0, %v1831_v26  ;;  %v1838_v37 = vmul.f32 2.0, %v1830_v27 }
 0x89e   :  { %2353 = vmatpush1.bf16.xpose.msra.mxu1 %v2653_v31  ;;  %2020 = vmatprep.mubr.f32.mxu1 %v1827_v22  ;;  %v1848_v4 = vcombine.low %v1832_v29, %v1833_v28  ;;  %v1849_v17 = vcombine.low %v1834_v32, %v1835_v30 }
 0x89f   :  { %2355 = vmatprep.subr.bf16.mxu1 %v2657_v35  ;;  %v1865_v18 = vcombine.low %v1836_v34, %v1837_v33  ;;  %v1866_v38 = vcombine.low %v1838_v37, %v1839_v36 }
 0x8a0   :  { %v1856_v39 = vrot.slane %v1848_v4, %v2631_v8  ;;  %v1863_v41 = vrot.slane %v1849_v17, %v2631_v8 }
 0x8a1   :  { %v1873_v63 = vrot.slane %v1865_v18, %v2631_v8  ;;  %v1880_v42 = vrot.slane %v1866_v38, %v2631_v8 }
 0x8a2   :  { %v1864_v43 = vcombine.low %v1856_v39, %v1863_v41 }
 0x8a3   :  { %v1881_v0 = vcombine.low %v1873_v63, %v1880_v42 }
 0x8a4   :  { %1884 = vst [vmem:[#allocation8] sm:$0xff] %v1864_v43 }
 0x8a5   :  { %2021 = vmatmul.mubr.f32.vlgmr.msra.gmra.mrb[14].mxu1 %v1826_v23  ;;  %1885 = vst [vmem:[#allocation8 + $0x8] sm:$0xff] %v1881_v0 }
 0x8a6   :  { %2357 = vmatpush1.bf16.xpose.msra.mxu1 %v2672_v57  ;;  %2090 = vmatprep.mubr.f32.mxu1 %v1829_v24 }
 0x8a7   :  { %2359 = vmatprep.subr.bf16.mxu1 %v2675_v61 }
 0x8ad   :  { %2091 = vmatmul.mubr.f32.vlgmr.msra.gmra.mrb[14].mxu1 %v1828_v25 }
 0x8ae   :  { %2361 = vmatpush1.bf16.xpose.msra.mxu1 %v2681_v6  ;;  %2160 = vmatprep.mubr.f32.mxu1 %v1831_v26 }
 0x8b5   :  { %2161 = vmatmul.mubr.f32.vlgmr.msra.gmra.mrb[14].mxu1 %v1830_v27 }
 0x988   :  { %v2162_v31 = vpop.f32.mrb[14].mxu1 }
 0x989   :  { %v2166_v35 = vmul.f32 2.0, %v2162_v31  ;;  %v2164_v44 = vpop.f32.mrb[15].mxu1 }
 0x98b   :  { %v2167_v8 = vadd.f32 %v2699_v40, %v2166_v35 }
 0x98d   :  { %v2168_v9 = vsel %vm407_vm3, %v2167_v8, -inf }
 0x98e   :  { %2169 = vmax.xlane.f32.xlu1 %v2168_v9 }
 0xa1b   :  { %v2170_v45 = vpop.xlane.xlu1 %2169 }
 0xa1c   :  { %v2171_v13 = vsub.f32 %v2167_v8, %v2170_v45 }
 0xa1e   :  { %v2172_v46 = vmul.f32 1.442695, %v2171_v13 }
 0xa20   :  { %2429 = vpow2.f32 %v2172_v46 }
 0xa2a   :  { %v2430_v57 = vpop.eup %2429 }
 0xa2b   :  { %v2174_v61 = vsel %vm407_vm3, %v2430_v57, 0.0 }
 0xa2c   :  { %2175 = vadd.xlane.f32.xlu0 %v2174_v61 }
 0xab9   :  { %v2176_v19 = vpop.xlane.xlu0 %2175 }
 0xaba   :  { %2431 = vlog2.f32 %v2176_v19 }
 0xac4   :  { %v2432_v6 = vpop.eup %2431 }
 0xac5   :  { %v2178_v47 = vmul.f32 0.6931472, %v2432_v6 }
 0xac7   :  { %v2179_v48 = vsub.f32 %v2171_v13, %v2178_v47 }
 0xac9   :  { %v2180_v49 = vsub.f32 %v2733_v7, %v2179_v48 }
 0xacb   :  { %v2181_v40 = vmul.f32 %v2736_v16, %v2180_v49 }
 0xacd   :  { %v2182_v50 = vsel %vm407_vm3, %v2181_v40, 0.0 }
 0xace   :  { %2183 = vadd.xlane.f32.xlu1 %v2182_v50 }
 0xacf   :  { %2510 = shalt.err (!%p2507_p0)
}
 0xad0   :  { %s2511_s9 = scalar_lea.hbm %s2858_s4, 256 }
 0xad1   :  { %p2512_p1 = scmp.ne.s32.totalorder %s2858_s4, %s2511_s9  ;;  %p2515_p2 = scmp.lt.u32.totalorder %s2511_s9, %s2858_s4 }
 0xad3   :  { %p2517_p3 = pnand %p2515_p2, %p2512_p1 }
 0xad5   :  { %2520 = shalt.err (!%p2517_p3)
}
 0xad6   :  { %2204 = dma.vmem_to_hbm [thread:$0]  %s2202_s30, 256, %s2858_s4, [#allocation4]   ;;  %vm2193_vm11 = vcmask 0  }
 0xad7   :  { %s2561_s15 = smov [#allocation9]  }
 0xad8   :  { %s2211_s16 = sshll.u32 %s2561_s15, 4  ;;  %s2212_s16 = int_to_ptr.vmem [resolvable:$true] %s2211_s16 }
 0xad9   :  { %s2521_s17 = scalar_lea.vmem %s2212_s16, 16  ;;  %s2525_s18 = scalar_lea.vmem %s2212_s16, 32 }
 0xada   :  { %p2522_p4 = scmp.ne.s32.totalorder %s2212_s16, %s2521_s17  ;;  %p2526_p5 = scmp.lt.s32.totalorder %s2212_s16, %s2212_s16 }
 0xadb   :  { %p2527_p6 = scmp.lt.s32.totalorder %s2525_s18, %s2521_s17 }
 0xadd   :  { %p2528_p7 = por %p2527_p6, %p2526_p5 }
 0xadf   :  { %p2529_p8 = pnand %p2528_p7, %p2522_p4 }
 0xb5b   :  { %v2184_v7 = vpop.xlane.xlu1 %2183 }
 0xb5c   :  { %v2185_v16 = vsel %vm470_vm0, %v2184_v7, 0.0 }
 0xb5d   :  { %v2186_v51 = vrot.slane %v2185_v16, 4 }
 0xb5f   :  { %v2187_v52 = vadd.f32 %v2186_v51, %v2185_v16 }
 0xb61   :  { %v2188_v53 = vrot.slane %v2187_v52, 2 }
 0xb63   :  { %v2189_v54 = vadd.f32 %v2188_v53, %v2187_v52 }
 0xb65   :  { %v2190_v55 = vrot.slane %v2189_v54, 1 }
 0xb67   :  { %v2191_v56 = vadd.f32 %v2190_v55, %v2189_v54 }
 0xb69   :  { %v2192_v58 = vmul.f32 0.5, %v2191_v56 }
 0xb6b   :  { %2194 = vst.msk [vmem:[#allocation9] sm:$0x1] %vm2193_vm11, %v2192_v58 }
 0xb6c   :  { %2532 = shalt.err (!%p2529_p8)
}
 0xb6d   :  { %s2533_s20 = scalar_lea.hbm %s2859_s5, 16 }
 0xb6e   :  { %p2534_p9 = scmp.ne.s32.totalorder %s2859_s5, %s2533_s20  ;;  %p2537_p10 = scmp.lt.u32.totalorder %s2533_s20, %s2859_s5 }
 0xb70   :  { %p2539_p11 = pnand %p2537_p10, %p2534_p9 }
 0xb72   :  { %2542 = shalt.err (!%p2539_p11)
}
 0xb73   :  { %2214 = dma.vmem_to_hbm [thread:$0]  %s2212_s16, 16, %s2859_s5, [#allocation10]  }
 0xb74   :  { %2547 = dma.done.wait [#allocation4], 256  }
 0xb75   :  { %2548 = vsyncadd [#allocation4], 4294967040 }
 0xb76   :  { %2549 = dma.done.wait [#allocation10], 16  }
 0xb77   :  { %2550 = vsyncadd [#allocation10], 4294967280 }
 0xb78   :  { %2221 = vsyncpa [#allocation3], 1 }
 0xb79   :  { %2222 = vsyncpa [#allocation6], 1 }
 0xb7a   :  { %2223 = vsyncpa [#allocation4], 1 }
 0xb7b   :  { %2224 = vsyncpa [#allocation10], 1 }

</bundles_post_ra>
